<compile_context>
chip_gen: v7x
topology: tpu7x:2x2x1
jax: 0.10.0
libtpu: 0.0.40
codegen_flags: <defaults>
</compile_context>

<pallas_src>
import jax
import jax.numpy as jnp
from jax.experimental import pallas as pl
from jax.experimental.pallas import tpu as pltpu

_PACK_MAX_COLS = 2048          # max packed width 2^p * W for dense pool matrices
_BIG_MAT_BYTES = 512 * 1024    # pool matrices above this are single-buffered


def _sublane_tile(itemsize):
    if itemsize >= 4:
        return 8
    if itemsize == 2:
        return 16
    return 32


def _vmem_budget():
    """Generation-dependent (target block bytes, VMEM cap, min steps, even grid)."""
    phys = None
    try:
        info = pltpu.get_tpu_info()
        for attr in ("vmem_capacity_bytes", "vmem_size_bytes", "vmem_bytes"):
            v = getattr(info, attr, None)
            if v:
                phys = int(v)
                break
    except Exception:
        phys = None
    if phys is None:
        phys = 64 * 1024 * 1024                       # conservative (v7x per-core)
    if phys >= 100 * 1024 * 1024:                     # v5e / v6e: 128 MiB VMEM
        return 12 * 1024 * 1024, 64 * 1024 * 1024, 2, False
    # v7x-class: 64 MiB per TensorCore, 2 cores -> even grid with >= 4 steps.
    return 6 * 1024 * 1024, 28 * 1024 * 1024, 4, True


def _padded_block_bytes(rows, cols, itemsize, sub, nbuf):
    """VMEM bytes of an (rows, cols) block with lane/sublane layout padding."""
    lanes = ((cols + 127) // 128) * 128
    subl = ((rows + sub - 1) // sub) * sub
    return nbuf * subl * lanes * itemsize


def _packed_pool_matrix(q, w, dtype):
    """(q*w, (q//2)*(w//2)) matrix averaging 2x2 pixel blocks of a row-packed slab.

    Packed input column j = r*w + c maps to output column (r//2)*(w//2) + (c//2)
    with weight 0.25 (four entries per output column) — the 0.5*0.5 is baked in,
    so no extra VPU multiply is needed in the kernel."""
    cols_in = q * w
    cols_out = (q // 2) * (w // 2)
    j = jnp.arange(cols_in, dtype=jnp.int32)
    dst = ((j // w) // 2) * (w // 2) + (j % w) // 2
    i = jnp.arange(cols_out, dtype=jnp.int32)
    sel = dst[:, None] == i[None, :]
    return jnp.where(sel, jnp.asarray(0.25, dtype), jnp.asarray(0.0, dtype))


def _make_pyramid_kernel(num_pool, compute_dtype):
    def kernel(*refs):
        pw_refs = refs[:num_pool]          # per-level (cols_l, cols_l/4) pool mats
        x_ref = refs[num_pool]             # (rows_per_block, cols_0) packed slab
        out_refs = refs[num_pool + 1:]     # one packed slab per pooled level
        src = x_ref[...]
        if src.dtype != compute_dtype:
            src = src.astype(compute_dtype)
        for lvl in range(num_pool):
            # Whole 2x2 pool of this level = one MXU matmul (0.25 weights).
            o = jnp.dot(src, pw_refs[lvl][...], preferred_element_type=jnp.float32)
            stored = o.astype(out_refs[lvl].dtype)
            out_refs[lvl][...] = stored
            # Next level consumes this level's value directly (no HBM trip).
            src = stored if stored.dtype == compute_dtype else o.astype(compute_dtype)
    return kernel


def _pyramid_levels_pallas(x, num_pool):
    """num_pool successive 2x2 avg-pool levels of NCHW `x` in one fused call.
    Requires H and W divisible by 2**num_pool (caller guarantees)."""
    N, C, H, W = x.shape
    q0 = 1 << num_pool
    assert H % q0 == 0 and W % q0 == 0
    dtype = x.dtype
    itemsize = dtype.itemsize
    B = N * C
    rows = (B * H) // q0                                # same row count at EVERY level
    cols = [(q0 >> l) * (W >> l) for l in range(num_pool + 1)]   # packed widths

    compute_dtype = jnp.bfloat16 if dtype == jnp.bfloat16 else jnp.float32
    mat_itemsize = jnp.dtype(compute_dtype).itemsize
    sub = _sublane_tile(itemsize)

    target_block_bytes, vmem_cap, min_steps, prefer_even_steps = _vmem_budget()

    mat_single_buf = [cols[l] * cols[l + 1] * mat_itemsize >= _BIG_MAT_BYTES
                      for l in range(num_pool)]

    def vmem_need(rpb):
        need = _padded_block_bytes(rpb, cols[0], itemsize, sub, 2)            # input
        for l in range(num_pool):
            need += _padded_block_bytes(rpb, cols[l + 1], itemsize, sub, 2)   # outputs
            need += _padded_block_bytes(cols[l], cols[l + 1], mat_itemsize, sub,
                                        1 if mat_single_buf[l] else 2)        # pool mats
        return need

    # Row block: ~target bytes of input per step, but keep >= min_steps grid steps.
    r_target = max(sub, target_block_bytes // max(1, cols[0] * itemsize))
    if rows >= min_steps * sub:
        r_target = min(r_target, pl.cdiv(rows, min_steps))
    rows_per_block = max(sub, (min(r_target, rows) // sub) * sub)
    while vmem_need(rows_per_block) > vmem_cap and rows_per_block > sub:
        rows_per_block = max(sub, ((rows_per_block // 2) // sub) * sub)
    need = vmem_need(rows_per_block)

    nblocks = pl.cdiv(rows, rows_per_block)
    if prefer_even_steps and nblocks > 1 and nblocks % 2 == 1:
        nblocks += 1        # balanced work for both TensorCores; extra block is padding
    rows_pad = nblocks * rows_per_block

    x_slab = x.reshape(rows, cols[0])
    if rows_pad != rows:
        # Padded rows are whole (zero) row groups: pooled to zeros, sliced off below.
        x_slab = jnp.pad(x_slab, ((0, rows_pad - rows), (0, 0)))

    pw_mats = [_packed_pool_matrix(q0 >> l, W >> l, compute_dtype)
               for l in range(num_pool)]

    in_specs = []
    for l in range(num_pool):
        kw = {"pipeline_mode": pl.Buffered(1)} if mat_single_buf[l] else {}
        in_specs.append(pl.BlockSpec((cols[l], cols[l + 1]), lambda i: (0, 0), **kw))
    in_specs.append(pl.BlockSpec((rows_per_block, cols[0]), lambda i: (i, 0)))
    out_specs = tuple(pl.BlockSpec((rows_per_block, cols[l + 1]), lambda i: (i, 0))
                      for l in range(num_pool))
    out_shape = tuple(jax.ShapeDtypeStruct((rows_pad, cols[l + 1]), dtype)
                      for l in range(num_pool))

    # Declared VMEM limit always covers the layout-padded need.
    vmem_limit = int(min(vmem_cap, max(16 * 1024 * 1024, need + (4 << 20))))
    if vmem_limit < need:
        vmem_limit = int(need + (2 << 20))

    flops = 0
    bytes_accessed = rows * cols[0] * itemsize
    for l in range(num_pool):
        flops += 2 * rows * cols[l] * cols[l + 1]
        bytes_accessed += rows * cols[l + 1] * itemsize
        bytes_accessed += cols[l] * cols[l + 1] * mat_itemsize

    outs = pl.pallas_call(
        _make_pyramid_kernel(num_pool, compute_dtype),
        out_shape=out_shape,
        grid_spec=pltpu.PrefetchScalarGridSpec(
            num_scalar_prefetch=0,
            grid=(nblocks,),
            in_specs=in_specs,
            out_specs=out_specs,
        ),
        compiler_params=pltpu.CompilerParams(
            dimension_semantics=("parallel",),
            vmem_limit_bytes=vmem_limit,
        ),
        cost_estimate=pl.CostEstimate(
            flops=int(flops), transcendentals=0,
            bytes_accessed=int(bytes_accessed)),
    )(*pw_mats, x_slab)

    if not isinstance(outs, (list, tuple)):
        outs = (outs,)

    results = []
    for l in range(num_pool):
        hl, wl = H >> (l + 1), W >> (l + 1)
        packed = outs[l][:rows]                 # drop row padding
        # Packed layout is exactly the row-major order of (N, C, hl, wl).
        results.append(packed.reshape(N, C, hl, wl))
    return results


def image_pyramid(x, num_levels=3):
    """JAX/Pallas equivalent of ImagePyramid.forward: returns a list of arrays."""
    pyramid = [x]
    cur = x
    remaining = num_levels - 1
    while remaining > 0:
        N, C, H, W = cur.shape
        if H < 2 or W < 2:
            raise ValueError("avg_pool2d(kernel_size=2) requires H, W >= 2")
        He, We = (H // 2) * 2, (W // 2) * 2
        if (He, We) != (H, W):
            # Same as PyTorch's implicit flooring of the last odd row/column.
            cur = cur[:, :, :He, :We]
        # Fuse as many consecutive levels as stay even-sized AND keep the packed
        # width (2^k * W) small enough for the dense per-level pool matrices.
        k = 1
        while (k < remaining
               and He % (1 << (k + 1)) == 0 and We % (1 << (k + 1)) == 0
               and (1 << (k + 1)) * We <= _PACK_MAX_COLS):
            k += 1
        # TODO(synk): for very wide images (2*W > _PACK_MAX_COLS) the dense
        # column-pool matrix should be tiled along W instead of materialized whole.
        outs = _pyramid_levels_pallas(cur, k)
        pyramid.extend(outs)
        cur = outs[-1]
        remaining -= k
    return pyramid


if __name__ == "__main__":
    key = jax.random.PRNGKey(0)
    # Small NCHW input consistent with the module's forward.
    x = jax.random.normal(key, (2, 4, 16, 16), dtype=jnp.float32)

    pyr = image_pyramid(x, num_levels=3)
    pyr = [jax.block_until_ready(p) for p in pyr]

    # Pure-JAX reference of repeated avg_pool2d(kernel_size=2).
    ref = [x]
    r = x
    for _ in range(2):
        N, C, H, W = r.shape
        r = r.reshape(N, C, H // 2, 2, W // 2, 2).mean(axis=(3, 5))
        ref.append(r)

    assert len(pyr) == 3
    expected_shapes = [(2, 4, 16, 16), (2, 4, 8, 8), (2, 4, 4, 4)]
    for p, rr, s in zip(pyr, ref, expected_shapes):
        assert p.shape == s, (p.shape, s)
        assert p.dtype == jnp.float32
        assert jnp.allclose(p, rr, atol=1e-5, rtol=1e-5), float(jnp.max(jnp.abs(p - rr)))

    print("KERNEL_OK")
</pallas_src>

<mosaic_0001>
module attributes {stable_mosaic.version = 11 : i64} {
  func.func @kernel(%arg0: i32, %arg1: memref<64x16xf32, #tpu.memory_space<vmem>>, %arg2: memref<16x4xf32, #tpu.memory_space<vmem>>, %arg3: memref<8x64xf32, #tpu.memory_space<vmem>>, %arg4: memref<8x16xf32, #tpu.memory_space<vmem>>, %arg5: memref<8x4xf32, #tpu.memory_space<vmem>>) attributes {dimension_semantics = [#tpu.dimension_semantics<parallel>], iteration_bounds = array<i64: 4>, scalar_prefetch = 0 : i64, scratch_operands = 0 : i64, tpu.core_type = #tpu.core_type<tc>, window_params = [{pipeline_mode = #tpu.pipeline_mode<synchronous>, transform_indices = @transform_0, window_bounds = array<i64: 64, 16>}, {pipeline_mode = #tpu.pipeline_mode<synchronous>, transform_indices = @transform_1, window_bounds = array<i64: 16, 4>}, {transform_indices = @transform_2, window_bounds = array<i64: 8, 64>}, {transform_indices = @transform_3, window_bounds = array<i64: 8, 16>}, {transform_indices = @transform_4, window_bounds = array<i64: 8, 4>}]} {
    %c0 = arith.constant 0 : index
    %c0_0 = arith.constant 0 : index
    %0 = vector.load %arg3[%c0, %c0_0] : memref<8x64xf32, #tpu.memory_space<vmem>>, vector<8x64xf32>
    %c0_1 = arith.constant 0 : index
    %c0_2 = arith.constant 0 : index
    %1 = vector.load %arg1[%c0_1, %c0_2] : memref<64x16xf32, #tpu.memory_space<vmem>>, vector<64x16xf32>
    %cst = arith.constant dense<0.000000e+00> : vector<8x16xf32>
    %2 = tpu.matmul %0, %1, %cst {dimension_numbers = #tpu.dot_dimension_numbers<[1], [0], [0], [1], [0, 0, 1, 1], [], []>} : vector<8x64xf32>, vector<64x16xf32>, vector<8x16xf32> -> vector<8x16xf32>
    %c0_3 = arith.constant 0 : index
    %c0_4 = arith.constant 0 : index
    %3 = vector.load %arg4[%c0_3, %c0_4] : memref<8x16xf32, #tpu.memory_space<vmem>>, vector<8x16xf32>
    tpu.vector_store %arg4[%c0_3, %c0_4], %2 {strides = array<i32>} : memref<8x16xf32, #tpu.memory_space<vmem>>, vector<8x16xf32>,
    %c0_5 = arith.constant 0 : index
    %c0_6 = arith.constant 0 : index
    %4 = vector.load %arg2[%c0_5, %c0_6] : memref<16x4xf32, #tpu.memory_space<vmem>>, vector<16x4xf32>
    %cst_7 = arith.constant dense<0.000000e+00> : vector<8x4xf32>
    %5 = tpu.matmul %2, %4, %cst_7 {dimension_numbers = #tpu.dot_dimension_numbers<[1], [0], [0], [1], [0, 0, 1, 1], [], []>} : vector<8x16xf32>, vector<16x4xf32>, vector<8x4xf32> -> vector<8x4xf32>
    %c0_8 = arith.constant 0 : index
    %c0_9 = arith.constant 0 : index
    %6 = vector.load %arg5[%c0_8, %c0_9] : memref<8x4xf32, #tpu.memory_space<vmem>>, vector<8x4xf32>
    tpu.vector_store %arg5[%c0_8, %c0_9], %5 {strides = array<i32>} : memref<8x4xf32, #tpu.memory_space<vmem>>, vector<8x4xf32>,
    return
  }
  func.func @transform_0(%arg0: i32) -> (i32, i32) {
    %c0_i32 = arith.constant 0 : i32
    %c0_i32_0 = arith.constant 0 : i32
    %c0_i32_1 = arith.constant 0 : i32
    return %c0_i32, %c0_i32_0 : i32, i32
  }
  func.func @transform_1(%arg0: i32) -> (i32, i32) {
    %c0_i32 = arith.constant 0 : i32
    %c0_i32_0 = arith.constant 0 : i32
    %c0_i32_1 = arith.constant 0 : i32
    return %c0_i32, %c0_i32_0 : i32, i32
  }
  func.func @transform_2(%arg0: i32) -> (i32, i32) {
    %c0_i32 = arith.constant 0 : i32
    %c0_i32_0 = arith.constant 0 : i32
    return %arg0, %c0_i32 : i32, i32
  }
  func.func @transform_3(%arg0: i32) -> (i32, i32) {
    %c0_i32 = arith.constant 0 : i32
    %c0_i32_0 = arith.constant 0 : i32
    return %arg0, %c0_i32 : i32, i32
  }
  func.func @transform_4(%arg0: i32) -> (i32, i32) {
    %c0_i32 = arith.constant 0 : i32
    %c0_i32_0 = arith.constant 0 : i32
    return %arg0, %c0_i32 : i32, i32
  }
}

</mosaic_0001>

<bundles_post_ra>
// kernel: tpu_custom_call.1
= control target key start
LH: loop header
LB: loop body
LE: loop exit
PB: predicated region body
PF: predicated region fallthrough
CT: control target
= control target key end

     0   :  { %s562_s15 = smov 0   ;;  %s612_s0 = inlined_call_operand.vmem [shape: f32[64,16], index: 0, kind: input, shape index: {}]   ;;  %s613_s1 = inlined_call_operand.vmem [shape: f32[16,4], index: 1, kind: input, shape index: {}]   ;;  %s614_s2 = inlined_call_operand.vmem [shape: f32[32,64], index: 2, kind: input, shape index: {}]   ;;  %s615_s3 = inlined_call_operand.vmem [shape: f32[32,16], index: 3, kind: output, shape index: {0}]   ;;  %s616_s4 = inlined_call_operand.vmem [shape: f32[32,4], index: 4, kind: output, shape index: {1}]  }
   0x1 LB: > { %s450_s16 = sadd.s32 4294967295, %s532_s15   ;;  %p454_p0 = scmp.ge.s32.totalorder %s532_s15, 1  ;;  %s532_s15 = sphi %s562_s15, %s15_s15  }
   0x2   : > { %p164_p1 = scmp.lt.s32.totalorder %s532_s15, 5 }
   0x4   : > { %p165_p2 = pnand %p454_p0, %p164_p1 }
   0x5   : > { %v205_v0 = vld [vmem:[%s612_s0] sm:$0xff] (!%p165_p2)  ;;  %v206_v1 = vld [vmem:[%s612_s0 + $0x8] sm:$0xff] (!%p165_p2)  ;;  %v207_v2 = vld [vmem:[%s612_s0 + $0x10] sm:$0xff] (!%p165_p2)  ;;  %v534_v3 = vmov (!%p165_p2), 0.0|0.0   ;;  %vm535_vm0 = vmmov (!%p165_p2), 0   ;;  %v536_v6 = vmov (!%p165_p2), 0.0  }
   0x6   : > { %168 = sbr.rel (%p165_p2) target bundleno = 448 (0x1c0), region = 32  ;;  %500 = vmatprep.subr.bf16.mxu0 (!%p165_p2), %v534_v3  ;;  %v501_v4 = vpack.c.bf16 (!%p165_p2), %v206_v1, %v205_v0  ;;  %v208_v5 = vld [vmem:[%s612_s0 + $0x18] sm:$0xff] (!%p165_p2)  ;;  %490 = vmatprep.mubr.msk.f32.mxu0 (!%p165_p2), %vm535_vm0, %v536_v6  ;;  %p192_p3 = scmp.lt.s32.totalorder (!%p165_p2), %s450_s16, 3  ;;  %v289_v7 = vld [vmem:[%s613_s1] sm:$0xff] (!%p165_p2)  ;;  %v290_v9 = vld [vmem:[%s613_s1 + $0x8] sm:$0xff] (!%p165_p2)  ;;  %vm213_vm1 = vcmask (!%p165_p2), 523264  }
   0x7   : > { %512 = vmatprep.subr.bf16.mxu1 (!%p165_p2), %v534_v3  ;;  %497 = vmatprep.mubr.msk.f32.mxu1 (!%p165_p2), %vm535_vm0, %v536_v6  ;;  %v504_v8 = vpack.c.bf16 (!%p165_p2), %v208_v5, %v207_v2  ;;  %v209_v10 = vld [vmem:[%s612_s0 + $0x20] sm:$0xff] (!%p165_p2)  ;;  %v210_v11 = vld [vmem:[%s612_s0 + $0x28] sm:$0xff] (!%p165_p2)  ;;  %v513_v12 = vpack.c.bf16 (!%p165_p2), %v290_v9, %v289_v7  ;;  %v211_v14 = vld [vmem:[%s612_s0 + $0x30] sm:$0xff] (!%p165_p2)  ;;  %vm287_vm2 = vcmask (!%p165_p2), 130048   ;;  %vm364_vm3 = vcmask (!%p165_p2), 31744  }
   0x8   : > { %502 = vmatpush3.bf16.msra.mxu0 (!%p165_p2), %v501_v4  ;;  %v507_v13 = vpack.c.bf16 (!%p165_p2), %v210_v11, %v209_v10  ;;  %v212_v15 = vld [vmem:[%s612_s0 + $0x38] sm:$0xff] (!%p165_p2) }
   0x9   : > { %503 = vmatprep.subr.bf16.mxu0 (!%p165_p2), %v534_v3  ;;  %514 = vmatpush3.bf16.msra.mxu1 (!%p165_p2), %v513_v12  ;;  %v510_v16 = vpack.c.bf16 (!%p165_p2), %v212_v15, %v211_v14 }
   0xc   : > { %505 = vmatpush3.bf16.msra.mxu0 (!%p165_p2), %v504_v8 }
   0xd   : > { %s618_s16 = smov (!%p192_p3, %s450_s16), 3  ;;  %506 = vmatprep.subr.bf16.mxu0 %v534_v3 }
   0xe   : > { %s455_s11 = sshll.u32 %s618_s16, 3 }
   0xf   : > { %s195_s14 = scalar_lea.vmem %s614_s2, %s455_s11  ;;  %s199_s19 = scalar_lea.vmem %s615_s3, %s455_s11 }
  0x10   : > { %508 = vmatpush3.bf16.msra.mxu0 %v507_v13  ;;  %v204_v17 = vld [vmem:[%s195_s14] sm:$0xff]  ;;  %s203_s21 = scalar_lea.vmem %s616_s4, %s455_s11 }
  0x11   : > { %509 = vmatprep.subr.bf16.mxu0 %v534_v3 }
  0x14   : > { %511 = vmatpush3.bf16.msra.mxu0 %v510_v16 }
  0x17   : > { %491 = vmatmul.mubr.msk.f32.vlgmr.msra.gmra.mrb[0].mxu0 %vm213_vm1, %v204_v17 }
  0xea   : > { %v283_v18 = vpop.f32.mrb[0].mxu0 }
  0xeb   : > { %288 = vst.msk [vmem:[%s199_s19] sm:$0xff] %vm287_vm2, %v283_v18  ;;  %v492_v19 = vpop.f32.mrb[1].mxu0  ;;  %498 = vmatmul.mubr.msk.f32.vlgmr.msra.gmra.mrb[0].mxu1 %vm287_vm2, %v283_v18 }
 0x1be   : > { %v360_v20 = vpop.f32.mrb[0].mxu1 }
 0x1bf   : > { %365 = vst.msk [vmem:[%s203_s21] sm:$0xff] %vm364_vm3, %v360_v20  ;;  %v499_v21 = vpop.f32.mrb[1].mxu1 }
 0x1c0 PF: > { %s15_s15 = sadd.s32 1, %s532_s15  }
 0x1c1   : > { %p12_p4 = scmp.ge.s32.totalorder %s15_s15, 6  }
 0x1c3   :  { %14 = sbr.rel (!%p12_p4) target bundleno = 1 (0x1), region = 74 }

</bundles_post_ra>
